<compile_context>
chip_gen: v7x
topology: tpu7x:2x2x1
jax: 0.10.0
libtpu: 0.0.40
codegen_flags: <defaults>
</compile_context>

<pallas_src>
import functools

import jax
import jax.numpy as jnp
from jax.experimental import pallas as pl
from jax.experimental.pallas import tpu as pltpu


# ----------------------------------------------------------------------------- kernels

def _elu(x):
    # ELU(alpha=1). exp(min(x,0)) - 1 avoids overflow on the positive branch.
    # TODO(synk): jnp.expm1 would be more precise for tiny negative activations
    # but is not guaranteed a Mosaic lowering rule, so exp(x)-1 is used.
    return jnp.where(x > 0.0, x, jnp.exp(jnp.minimum(x, 0.0)) - 1.0)


def _mlp_logits(state_ref, det_ref, w1s_ref, w1d_ref, b1_ref, w23_ref, b23_ref):
    """ELU(state@W1s + det@W1d + b1) @ W23 + b23, padded to 128 lanes (pads ~ -1e30)."""
    h1 = (jnp.dot(state_ref[...], w1s_ref[...], preferred_element_type=jnp.float32)
          + jnp.dot(det_ref[...], w1d_ref[...], preferred_element_type=jnp.float32)
          + b1_ref[...])
    h1 = _elu(h1)
    logits = (jnp.dot(h1.astype(jnp.bfloat16), w23_ref[...],
                      preferred_element_type=jnp.float32)
              + b23_ref[...])
    return logits                                   # (B, A_PAD) f32


def _action_train_kernel(state_ref, det_ref, gumbel_ref,
                         w1s_ref, w1d_ref, b1_ref, w23_ref, b23_ref,
                         onehot_ref, probs_ref):
    logits = _mlp_logits(state_ref, det_ref, w1s_ref, w1d_ref, b1_ref,
                         w23_ref, b23_ref)

    # softmax -> probs (OneHotCategorical.probs); padded lanes underflow to 0.
    m = jnp.max(logits, axis=-1, keepdims=True)
    e = jnp.exp(logits - m)
    probs_ref[...] = e / jnp.sum(e, axis=-1, keepdims=True)

    # OneHotCategorical sample via Gumbel-max (noise generated outside kernel).
    pert = logits + gumbel_ref[...]
    a_pad = pert.shape[-1]
    iota = jax.lax.broadcasted_iota(jnp.int32, pert.shape, 1)
    pmax = jnp.max(pert, axis=-1, keepdims=True)
    first_idx = jnp.min(jnp.where(pert == pmax, iota, a_pad), axis=-1, keepdims=True)
    onehot_ref[...] = (iota == first_idx).astype(jnp.float32)


def _action_eval_kernel(state_ref, det_ref,
                        w1s_ref, w1d_ref, b1_ref, w23_ref, b23_ref,
                        idx_ref):
    logits = _mlp_logits(state_ref, det_ref, w1s_ref, w1d_ref, b1_ref,
                         w23_ref, b23_ref)
    # argmax(probs) == argmax(logits); softmax / PRNG skipped entirely.
    a_pad = logits.shape[-1]
    iota = jax.lax.broadcasted_iota(jnp.int32, logits.shape, 1)
    m = jnp.max(logits, axis=-1, keepdims=True)
    idx = jnp.min(jnp.where(logits == m, iota, a_pad), axis=-1, keepdims=True)
    idx_ref[...] = idx.astype(jnp.int32)


# ----------------------------------------------------------------------------- wrapper

@functools.partial(jax.jit, static_argnames=("action_dim", "training"))
def action_discrete_forward(state, deterministic, fused, key, action_dim,
                            training=True):
    """Pallas implementation of ActionDiscrete.forward.

    `fused` comes from prepare_params(); `key` must differ per call for fresh
    samples (only used when training=True).
    """
    batch = state.shape[0]
    a_pad = fused["w23"].shape[1]
    vmem = pl.BlockSpec(memory_space=pltpu.MemorySpace.VMEM)

    # bf16 MXU operands; all elementwise math stays f32 inside the kernel.
    state_bf = state.astype(jnp.bfloat16)
    det_bf = deterministic.astype(jnp.bfloat16)

    if training:
        gumbel = jax.random.gumbel(key, (batch, a_pad), jnp.float32)
        onehot, probs = pl.pallas_call(
            _action_train_kernel,
            out_shape=(
                jax.ShapeDtypeStruct((batch, a_pad), jnp.float32),
                jax.ShapeDtypeStruct((batch, a_pad), jnp.float32),
            ),
            in_specs=[vmem] * 8,
            out_specs=(vmem, vmem),
        )(state_bf, det_bf, gumbel,
          fused["w1s"], fused["w1d"], fused["b1"], fused["w23"], fused["b23"])
        onehot = onehot[:, :action_dim]
        probs = probs[:, :action_dim]
        # TODO(synk): straight-through gradients through probs require a
        # custom_vjp over the pallas_call; forward value is exact.
        return onehot + probs - jax.lax.stop_gradient(probs)
    else:
        idx = pl.pallas_call(
            _action_eval_kernel,
            out_shape=jax.ShapeDtypeStruct((batch, 1), jnp.int32),
            in_specs=[vmem] * 7,
            out_specs=vmem,
        )(state_bf, det_bf,
          fused["w1s"], fused["w1d"], fused["b1"], fused["w23"], fused["b23"])
        return idx[:, 0]


# ----------------------------------------------------------------------------- params

def init_params(key, in_dim, hidden, action_dim):
    """PyTorch nn.Linear default init (U(-1/sqrt(fan_in), 1/sqrt(fan_in)))."""
    def linear(k, fan_in, fan_out):
        kw, kb = jax.random.split(k)
        bound = 1.0 / jnp.sqrt(fan_in)
        w = jax.random.uniform(kw, (fan_in, fan_out), jnp.float32, -bound, bound)
        b = jax.random.uniform(kb, (1, fan_out), jnp.float32, -bound, bound)
        return w, b

    k1, k2, k3 = jax.random.split(key, 3)
    w1, b1 = linear(k1, in_dim, hidden)
    w2, b2 = linear(k2, hidden, hidden)
    w3, b3 = linear(k3, hidden, action_dim)
    return {"w1": w1, "b1": b1, "w2": w2, "b2": b2, "w3": w3, "b3": b3}


def prepare_params(params, state_size, action_dim):
    """Fold W2@W3, split W1 at the concat boundary, pad actions to 128 lanes,
    and cast matmul weights to bf16 (biases stay f32)."""
    hidden = params["w2"].shape[0]
    a_pad = ((action_dim + 127) // 128) * 128

    w23 = params["w2"] @ params["w3"]                       # (hidden, A)
    b23 = params["b2"] @ params["w3"] + params["b3"]        # (1, A)

    w23p = jnp.zeros((hidden, a_pad), jnp.float32).at[:, :action_dim].set(w23)
    b23p = jnp.full((1, a_pad), -1e30, jnp.float32).at[:, :action_dim].set(b23)

    return {
        "w1s": params["w1"][:state_size].astype(jnp.bfloat16),
        "w1d": params["w1"][state_size:].astype(jnp.bfloat16),
        "b1": params["b1"].astype(jnp.float32),
        "w23": w23p.astype(jnp.bfloat16),
        "b23": b23p,
    }


# ----------------------------------------------------------------------------- main

if __name__ == "__main__":
    # Small shapes consistent with the module:
    #   args.state_size = 16, args.deterministic_size = 16, action_dim = 6, batch = 8
    STATE_SIZE = 16
    DET_SIZE = 16
    HIDDEN = 256
    ACTION_DIM = 6
    BATCH = 8

    key = jax.random.PRNGKey(0)
    k_state, k_det, k_params, k_sample = jax.random.split(key, 4)

    state = jax.random.normal(k_state, (BATCH, STATE_SIZE), jnp.float32)
    deterministic = jax.random.normal(k_det, (BATCH, DET_SIZE), jnp.float32)

    params = init_params(k_params, STATE_SIZE + DET_SIZE, HIDDEN, ACTION_DIM)
    fused = prepare_params(params, STATE_SIZE, ACTION_DIM)

    # training path: straight-through one-hot actions
    action_train = action_discrete_forward(state, deterministic, fused, k_sample,
                                           action_dim=ACTION_DIM, training=True)
    action_train = jax.block_until_ready(action_train)

    # eval path: argmax indices (int32) computed inside the kernel
    action_eval = action_discrete_forward(state, deterministic, fused, k_sample,
                                          action_dim=ACTION_DIM, training=False)
    action_eval = jax.block_until_ready(action_eval)

    # sanity checks: one-hot rows sum to 1 and are {0,1}; eval indices in range
    assert action_train.shape == (BATCH, ACTION_DIM)
    assert jnp.allclose(jnp.sum(action_train, axis=-1), 1.0, atol=1e-5)
    assert bool(jnp.all((action_train >= -1e-6) & (action_train <= 1.0 + 1e-6)))
    assert action_eval.shape == (BATCH,)
    assert action_eval.dtype == jnp.int32
    assert bool(jnp.all((action_eval >= 0) & (action_eval < ACTION_DIM)))

    print("KERNEL_OK")
</pallas_src>

<mosaic_0001>
module attributes {stable_mosaic.version = 11 : i64} {
  func.func @_action_train_kernel(%arg0: memref<8x16xbf16, #tpu.memory_space<vmem>>, %arg1: memref<8x16xbf16, #tpu.memory_space<vmem>>, %arg2: memref<8x128xf32, #tpu.memory_space<vmem>>, %arg3: memref<16x256xbf16, #tpu.memory_space<vmem>>, %arg4: memref<16x256xbf16, #tpu.memory_space<vmem>>, %arg5: memref<1x256xf32, #tpu.memory_space<vmem>>, %arg6: memref<256x128xbf16, #tpu.memory_space<vmem>>, %arg7: memref<1x128xf32, #tpu.memory_space<vmem>>, %arg8: memref<8x128xf32, #tpu.memory_space<vmem>>, %arg9: memref<8x128xf32, #tpu.memory_space<vmem>>) attributes {dimension_semantics = [], scalar_prefetch = 0 : i64, scratch_operands = 0 : i64, tpu.core_type = #tpu.core_type<tc>} {
    %c0 = arith.constant 0 : index
    %c0_0 = arith.constant 0 : index
    %0 = vector.load %arg0[%c0, %c0_0] : memref<8x16xbf16, #tpu.memory_space<vmem>>, vector<8x16xbf16>
    %c0_1 = arith.constant 0 : index
    %c0_2 = arith.constant 0 : index
    %1 = vector.load %arg3[%c0_1, %c0_2] : memref<16x256xbf16, #tpu.memory_space<vmem>>, vector<16x256xbf16>
    %cst = arith.constant dense<0.000000e+00> : vector<8x256xf32>
    %2 = tpu.matmul %0, %1, %cst {dimension_numbers = #tpu.dot_dimension_numbers<[1], [0], [0], [1], [0, 0, 1, 1], [], []>} : vector<8x16xbf16>, vector<16x256xbf16>, vector<8x256xf32> -> vector<8x256xf32>
    %c0_3 = arith.constant 0 : index
    %c0_4 = arith.constant 0 : index
    %3 = vector.load %arg1[%c0_3, %c0_4] : memref<8x16xbf16, #tpu.memory_space<vmem>>, vector<8x16xbf16>
    %c0_5 = arith.constant 0 : index
    %c0_6 = arith.constant 0 : index
    %4 = vector.load %arg4[%c0_5, %c0_6] : memref<16x256xbf16, #tpu.memory_space<vmem>>, vector<16x256xbf16>
    %cst_7 = arith.constant dense<0.000000e+00> : vector<8x256xf32>
    %5 = tpu.matmul %3, %4, %cst_7 {dimension_numbers = #tpu.dot_dimension_numbers<[1], [0], [0], [1], [0, 0, 1, 1], [], []>} : vector<8x16xbf16>, vector<16x256xbf16>, vector<8x256xf32> -> vector<8x256xf32>
    %6 = arith.addf %2, %5 : vector<8x256xf32>
    %c0_8 = arith.constant 0 : index
    %c0_9 = arith.constant 0 : index
    %7 = vector.load %arg5[%c0_8, %c0_9] : memref<1x256xf32, #tpu.memory_space<vmem>>, vector<1x256xf32>
    %8 = vector.broadcast %7 : vector<1x256xf32> to vector<8x256xf32>
    %9 = arith.addf %6, %8 : vector<8x256xf32>
    %cst_10 = arith.constant 0.000000e+00 : f32
    %10 = vector.broadcast %cst_10 : f32 to vector<8x256xf32>
    %11 = arith.cmpf ogt, %9, %10 : vector<8x256xf32>
    %cst_11 = arith.constant 0.000000e+00 : f32
    %12 = vector.broadcast %cst_11 : f32 to vector<8x256xf32>
    %13 = arith.minimumf %9, %12 : vector<8x256xf32>
    %14 = math.exp %13 : vector<8x256xf32>
    %cst_12 = arith.constant 1.000000e+00 : f32
    %15 = vector.broadcast %cst_12 : f32 to vector<8x256xf32>
    %16 = arith.subf %14, %15 : vector<8x256xf32>
    %17 = arith.select %11, %9, %16 : vector<8x256xi1>, vector<8x256xf32>
    %18 = arith.truncf %17 : vector<8x256xf32> to vector<8x256xbf16>
    %c0_13 = arith.constant 0 : index
    %c0_14 = arith.constant 0 : index
    %19 = vector.load %arg6[%c0_13, %c0_14] : memref<256x128xbf16, #tpu.memory_space<vmem>>, vector<256x128xbf16>
    %cst_15 = arith.constant dense<0.000000e+00> : vector<8x128xf32>
    %20 = tpu.matmul %18, %19, %cst_15 {dimension_numbers = #tpu.dot_dimension_numbers<[1], [0], [0], [1], [0, 0, 1, 1], [], []>} : vector<8x256xbf16>, vector<256x128xbf16>, vector<8x128xf32> -> vector<8x128xf32>
    %c0_16 = arith.constant 0 : index
    %c0_17 = arith.constant 0 : index
    %21 = vector.load %arg7[%c0_16, %c0_17] : memref<1x128xf32, #tpu.memory_space<vmem>>, vector<1x128xf32>
    %22 = vector.broadcast %21 : vector<1x128xf32> to vector<8x128xf32>
    %23 = arith.addf %20, %22 : vector<8x128xf32>
    %cst_18 = arith.constant dense<0xFF800000> : vector<8xf32>
    %24 = vector.multi_reduction <maximumf>, %23, %cst_18 [1] : vector<8x128xf32> to vector<8xf32>
    %25 = vector.shape_cast %24 : vector<8xf32> to vector<8x1xf32>
    %26 = vector.broadcast %25 : vector<8x1xf32> to vector<8x128xf32>
    %27 = arith.subf %23, %26 : vector<8x128xf32>
    %28 = math.exp %27 : vector<8x128xf32>
    %cst_19 = arith.constant dense<0.000000e+00> : vector<8xf32>
    %29 = vector.multi_reduction <add>, %28, %cst_19 [1] : vector<8x128xf32> to vector<8xf32>
    %30 = vector.shape_cast %29 : vector<8xf32> to vector<8x1xf32>
    %31 = vector.broadcast %30 : vector<8x1xf32> to vector<8x128xf32>
    %32 = arith.divf %28, %31 : vector<8x128xf32>
    %c0_20 = arith.constant 0 : index
    %c0_21 = arith.constant 0 : index
    %33 = vector.load %arg9[%c0_20, %c0_21] : memref<8x128xf32, #tpu.memory_space<vmem>>, vector<8x128xf32>
    tpu.vector_store %arg9[%c0_20, %c0_21], %32 {strides = array<i32>} : memref<8x128xf32, #tpu.memory_space<vmem>>, vector<8x128xf32>,
    %c0_22 = arith.constant 0 : index
    %c0_23 = arith.constant 0 : index
    %34 = vector.load %arg2[%c0_22, %c0_23] : memref<8x128xf32, #tpu.memory_space<vmem>>, vector<8x128xf32>
    %35 = arith.addf %23, %34 : vector<8x128xf32>
    %36 = tpu.iota {dimensions = array<i32: 1>} : vector<8x128xi32>
    %cst_24 = arith.constant dense<0xFF800000> : vector<8xf32>
    %37 = vector.multi_reduction <maximumf>, %35, %cst_24 [1] : vector<8x128xf32> to vector<8xf32>
    %38 = vector.shape_cast %37 : vector<8xf32> to vector<8x1xf32>
    %39 = vector.broadcast %38 : vector<8x1xf32> to vector<8x128xf32>
    %40 = arith.cmpf oeq, %35, %39 : vector<8x128xf32>
    %c128_i32 = arith.constant 128 : i32
    %41 = vector.broadcast %c128_i32 : i32 to vector<8x128xi32>
    %42 = arith.select %40, %36, %41 : vector<8x128xi1>, vector<8x128xi32>
    %cst_25 = arith.constant dense<2147483647> : vector<8xi32>
    %43 = vector.multi_reduction <minsi>, %42, %cst_25 [1] : vector<8x128xi32> to vector<8xi32>
    %44 = vector.shape_cast %43 : vector<8xi32> to vector<8x1xi32>
    %45 = vector.broadcast %44 : vector<8x1xi32> to vector<8x128xi32>
    %46 = arith.cmpi eq, %36, %45 : vector<8x128xi32>
    %47 = arith.extui %46 : vector<8x128xi1> to vector<8x128xi32>
    %48 = arith.sitofp %47 : vector<8x128xi32> to vector<8x128xf32>
    %c0_26 = arith.constant 0 : index
    %c0_27 = arith.constant 0 : index
    %49 = vector.load %arg8[%c0_26, %c0_27] : memref<8x128xf32, #tpu.memory_space<vmem>>, vector<8x128xf32>
    tpu.vector_store %arg8[%c0_26, %c0_27], %48 {strides = array<i32>} : memref<8x128xf32, #tpu.memory_space<vmem>>, vector<8x128xf32>,
    return
  }
}

</mosaic_0001>

<bundles_post_ra>
// kernel: action_discrete_forward.1
= control target key start
LH: loop header
LB: loop body
LE: loop exit
PB: predicated region body
PF: predicated region fallthrough
CT: control target
= control target key end

     0   :  { %15 = vsyncpa [#allocation3], 0  ;;  %s516_s30 = smov [#allocation2]   ;;  %s616_s0 = inlined_call_operand.vmem [shape: bf16[8,16], index: 0, kind: input, shape index: {}]   ;;  %s617_s1 = inlined_call_operand.vmem [shape: bf16[8,16], index: 1, kind: input, shape index: {}]   ;;  %s618_s2 = inlined_call_operand.vmem [shape: f32[8,128], index: 2, kind: input, shape index: {}]   ;;  %s619_s3 = inlined_call_operand.vmem [shape: bf16[16,256], index: 3, kind: input, shape index: {}]   ;;  %s620_s4 = inlined_call_operand.vmem [shape: bf16[16,256], index: 4, kind: input, shape index: {}]   ;;  %s621_s5 = inlined_call_operand.vmem [shape: f32[1,256], index: 5, kind: input, shape index: {}]   ;;  %s622_s6 = inlined_call_operand.hbm [shape: bf16[256,128], index: 6, kind: input, shape index: {}]   ;;  %s623_s7 = inlined_call_operand.vmem [shape: f32[1,128], index: 7, kind: input, shape index: {}]   ;;  %s624_s8 = inlined_call_operand.vmem [shape: f32[8,128], index: 8, kind: output, shape index: {0}]   ;;  %s625_s9 = inlined_call_operand.vmem [shape: f32[8,128], index: 9, kind: output, shape index: {1}]  }
   0x1   :  { %s33_s10 = sshll.u32 %s516_s30, 4  ;;  %s492_s13 = scalar_lea.hbm %s622_s6, 2048  ;;  %s34_s10 = int_to_ptr.vmem [resolvable:$true] %s33_s10 }
   0x2   :  { %p493_p0 = scmp.ne.s32.totalorder %s622_s6, %s492_s13  ;;  %p496_p1 = scmp.lt.u32.totalorder %s492_s13, %s622_s6 }
   0x4   :  { %p498_p2 = pnand %p496_p1, %p493_p0 }
   0x6   :  { %501 = shalt.err (!%p498_p2)
}
   0x7   :  { %s502_s18 = scalar_lea.vmem %s34_s10, 2048  ;;  %p507_p4 = scmp.lt.s32.totalorder %s34_s10, %s34_s10 }
   0x8   :  { %p503_p3 = scmp.ne.s32.totalorder %s34_s10, %s502_s18  ;;  %p508_p5 = scmp.lt.s32.totalorder %s502_s18, %s502_s18 }
   0xa   :  { %p509_p6 = por %p508_p5, %p507_p4 }
   0xc   :  { %p510_p7 = pnand %p509_p6, %p503_p3 }
   0xe   :  { %513 = shalt.err (!%p510_p7)
}
   0xf   :  { %s517_s19 = smov 64   ;;  %s518_s20 = smov 4  }
  0x10   :  { %39 = dma.hbm_to_vmem [thread:$0]  %s622_s6, 2048, %s34_s10, [#allocation3], %s517_s19, %s517_s19, %s518_s20  }
  0x11   :  { %514 = dma.done.wait [#allocation3], 2048  }
  0x12   :  { %515 = vsyncadd [#allocation3], 4294965248  ;;  %v519_v0 = vmov 0   ;;  %v462_v1 = vld [vmem:[%s620_s4 + $0x4] ss:$8 sps:$4 sm:$0xff]   ;;  %vm62_vm0 = vcmask 130048   ;;  %v163_v23 = vlaneseq }
  0x13   :  { %98 = vmatprep.mubr.bf16.mxu1 %v519_v0  ;;  %v464_v2 = vld [vmem:[%s620_s4] ss:$8 sps:$4 sm:$0xff]   ;;  %66 = vmatprep.subr.bf16.mxu1 %v462_v1  ;;  %v467_v4 = vld [vmem:[%s619_s3 + $0x4] ss:$8 sps:$4 sm:$0xff]   ;;  %v472_v11 = vld [vmem:[#allocation2 + $0x50] sm:$0xff]  }
  0x14   :  { %v49_v3 = vld [vmem:[%s617_s1] sm:$0xf]  ;;  %67 = vmatpush1.bf16.msra.mxu1 %v464_v2  ;;  %v470_v9 = vld [vmem:[#allocation2 + $0x48] sm:$0xff]   ;;  %v473_v12 = vld [vmem:[#allocation2 + $0x10] sm:$0xff]   ;;  %v164_v24 = vshrl.u32 %v163_v23, 7  ;;  %v377_v63 = vand.u32 127, %v163_v23 }
  0x15   :  { %v465_v5 = vld [vmem:[%s619_s3] ss:$8 sps:$4 sm:$0xff]   ;;  %120 = vmatprep.subr.bf16.mxu1 %v467_v4  ;;  %v474_v13 = vld [vmem:[#allocation2 + $0x58] sm:$0xff]   ;;  %v480_v19 = vld [vmem:[#allocation2 + $0x70] sm:$0xff]  }
  0x16   :  { %v46_v6 = vld [vmem:[%s616_s0] sm:$0xf]  ;;  %v471_v10 = vld [vmem:[#allocation2 + $0x8] sm:$0xff]   ;;  %v475_v14 = vld [vmem:[#allocation2 + $0x18] sm:$0xff]   ;;  %v165_v29 = vsub.s32 0, %v164_v24  ;;  %v169_v31 = vsub.s32 1, %v164_v24 }
  0x17   :  { %411 = vmatmul.mubr.msk.bf16.vlgmr.msra.gmra.mrb[0].mxu1 %vm62_vm0, %v49_v3  ;;  %v468_v7 = vld [vmem:[#allocation2 + $0x40] sm:$0xff]   ;;  %v478_v17 = vld [vmem:[#allocation2 + $0x68] sm:$0xff]   ;;  %v481_v20 = vld [vmem:[#allocation2 + $0x30] sm:$0xff]  }
  0x18   :  { %121 = vmatpush1.bf16.msra.mxu1 %v465_v5  ;;  %152 = vmatprep.mubr.bf16.mxu1 %v519_v0  ;;  %v469_v8 = vld [vmem:[#allocation2] sm:$0xff]   ;;  %v479_v18 = vld [vmem:[#allocation2 + $0x28] sm:$0xff]   ;;  %v482_v21 = vld [vmem:[#allocation2 + $0x78] sm:$0xff]  }
  0x19   :  { %435 = vmatprep.subr.bf16.mxu0 %v468_v7  ;;  %v476_v15 = vld [vmem:[#allocation2 + $0x60] sm:$0xff]   ;;  %v483_v22 = vld [vmem:[#allocation2 + $0x38] sm:$0xff]  }
  0x1a   :  { %436 = vmatpush3.bf16.msra.mxu0 %v469_v8  ;;  %v477_v16 = vld [vmem:[#allocation2 + $0x20] sm:$0xff]  }
  0x1b   :  { %437 = vmatprep.subr.bf16.mxu0 %v470_v9  ;;  %v161_v30 = vld [vmem:[%s621_s5] sm:$0x3] }
  0x1c   :  { %v166_v32 = vrot.slane %v161_v30, %v165_v29  ;;  %v170_v34 = vrot.slane %v161_v30, %v169_v31  ;;  %v417_v55 = vld [vmem:[%s623_s7] ss:$0 sm:$0xff] }
  0x1d   :  { %v374_v60 = vld [vmem:[%s618_s2] sm:$0xff] }
  0x1e   :  { %438 = vmatpush3.bf16.msra.mxu0 %v471_v10 }
  0x1f   :  { %414 = vmatmul.mubr.msk.bf16.vlgmr.msra.gmra.mrb[4].mxu1 %vm62_vm0, %v46_v6  ;;  %439 = vmatprep.subr.bf16.mxu0 %v472_v11 }
  0x22   :  { %440 = vmatpush3.bf16.msra.mxu0 %v473_v12 }
  0x23   :  { %441 = vmatprep.subr.bf16.mxu0 %v474_v13 }
  0x26   :  { %442 = vmatpush3.bf16.msra.mxu0 %v475_v14 }
  0x27   :  { %443 = vmatprep.subr.bf16.mxu0 %v476_v15 }
  0x2a   :  { %444 = vmatpush3.bf16.msra.mxu0 %v477_v16 }
  0x2b   :  { %445 = vmatprep.subr.bf16.mxu0 %v478_v17 }
  0x2e   :  { %446 = vmatpush3.bf16.msra.mxu0 %v479_v18 }
  0x2f   :  { %447 = vmatprep.subr.bf16.mxu0 %v480_v19 }
  0x32   :  { %448 = vmatpush3.bf16.msra.mxu0 %v481_v20  ;;  %v520_v20 = vmov 0.0  }
  0x33   :  { %449 = vmatprep.subr.bf16.mxu0 %v482_v21 }
  0x36   :  { %450 = vmatpush3.bf16.msra.mxu0 %v483_v22 }
  0xea   :  { %v100_v25 = vpop.f32.mrb[0].mxu1 }
  0xeb   :  { %v102_v26 = vpop.f32.mrb[1].mxu1 }
  0xec   :  { %v104_v27 = vpop.f32.mrb[2].mxu1 }
  0xed   :  { %v105_v28 = vpop.f32.mrb[3].mxu1 }
  0xf2   :  { %v154_v33 = vpop.f32.mrb[4].mxu1 }
  0xf3   :  { %v155_v35 = vadd.f32 %v154_v33, %v100_v25  ;;  %v156_v36 = vpop.f32.mrb[5].mxu1 }
  0xf4   :  { %v157_v37 = vadd.f32 %v156_v36, %v102_v26  ;;  %v158_v38 = vpop.f32.mrb[6].mxu1 }
  0xf5   :  { %v173_v39 = vadd.f32 %v166_v32, %v155_v35  ;;  %v159_v40 = vpop.f32.mrb[7].mxu1 }
  0xf6   :  { %v174_v41 = vadd.f32 %v170_v34, %v157_v37 }
  0xf7   :  { %v177_v42 = vmin.f32 %v173_v39, 0.0  ;;  %vm175_vm1 = vcmp.gt.f32.partialorder %v173_v39, 0.0 }
  0xf8   :  { %v178_v43 = vmin.f32 %v174_v41, 0.0  ;;  %vm176_vm2 = vcmp.gt.f32.partialorder %v174_v41, 0.0 }
  0xf9   :  { %v179_v44 = vmul.f32 1.442695, %v177_v42 }
  0xfa   :  { %v181_v45 = vmul.f32 1.442695, %v178_v43 }
  0xfb   :  { %484 = vpow2.f32 %v179_v44 }
  0xfc   :  { %486 = vpow2.f32 %v181_v45 }
 0x105   :  { %v485_v46 = vpop.eup %484 }
 0x106   :  { %v487_v47 = vpop.eup %486  ;;  %v415_v48 = vadd.f32 -1.0, %v485_v46 }
 0x107   :  { %v416_v49 = vadd.f32 -1.0, %v487_v47 }
 0x108   :  { %v185_v50 = vsel %vm175_vm1, %v173_v39, %v415_v48 }
 0x109   :  { %v186_v51 = vsel %vm176_vm2, %v174_v41, %v416_v49  ;;  %v187_v53 = vpack.c.bf16 %v185_v50, %v185_v50 }
 0x10a   :  { %v188_v52 = vpack.c.bf16 %v186_v51, %v186_v51 }
 0x10c   :  { %356 = vmatprep.mubr.bf16.mxu0 %v188_v52 }
 0x10d   :  { %357 = vmatmul.mubr.bf16.vlgmr.msra.gmra.mrb[0].mxu0 %v187_v53 }
 0x1e0   :  { %v451_v54 = vpop.f32.mrb[0].mxu0 }
 0x1e1   :  { %v452_v56 = vpop.f32.mrb[1].mxu0 }
 0x1e2   :  { %v453_v57 = vadd.f32 %v452_v56, %v451_v54  ;;  %v454_v58 = vpop.f32.mrb[2].mxu0 }
 0x1e3   :  { %v455_v59 = vpop.f32.mrb[3].mxu0 }
 0x1e4   :  { %v359_v61 = vadd.f32 %v453_v57, %v417_v55 }
 0x1e6   :  { %v375_v62 = vadd.f32 %v374_v60, %v359_v61 }
 0x1e8   :  { %378 = vmax.xlane.f32.xlu0 %v375_v62 }
 0x1ec   :  { %364 = vmax.xlane.f32.xlu0 %v359_v61 }
 0x275   :  { %v379_v0 = vpop.xlane.xlu0 %378 }
 0x276   :  { %vm380_vm3 = vcmp.eq.f32.partialorder %v375_v62, %v379_v0 }
 0x277   :  { %v381_v1 = vsel %vm380_vm3, %v377_v63, 128 }
 0x278   :  { %v383_v2 = vshra.s32 %v381_v1, 16  ;;  %v382_v8 = vand.u32 65535, %v381_v1 }
 0x279   :  { %v365_v3 = vpop.xlane.xlu0 %364 }
 0x27a   :  { %v366_v4 = vsub.f32 %v359_v61, %v365_v3  ;;  %v385_v5 = vcvt.s32.f32 %v383_v2  ;;  %v384_v10 = vcvt.s32.f32 %v382_v8 }
 0x27c   :  { %v367_v6 = vmul.f32 1.442695, %v366_v4  ;;  %386 = vmin.xlane.f32.xlu1 %v385_v5 }
 0x27e   :  { %488 = vpow2.f32 %v367_v6 }
 0x288   :  { %v489_v7 = vpop.eup %488 }
 0x289   :  { %369 = vadd.xlane.f32.xlu1 %v489_v7 }
 0x309   :  { %v387_v9 = vpop.xlane.xlu1 %386 }
 0x30a   :  { %vm388_vm4 = vcmp.eq.f32.partialorder %v385_v5, %v387_v9  ;;  %v393_v15 = vcvt.f32.s32 %v387_v9 }
 0x30b   :  { %v389_v11 = vsel %vm388_vm4, %v384_v10, inf }
 0x30c   :  { %390 = vmin.xlane.f32.xlu0 %v389_v11  ;;  %v394_v17 = vshll.u32 %v393_v15, 16 }
 0x316   :  { %v370_v12 = vpop.xlane.xlu1 %369 }
 0x317   :  { %490 = vrcp.f32 %v370_v12 }
 0x321   :  { %v491_v13 = vpop.eup %490 }
 0x322   :  { %v372_v14 = vmul.f32 %v491_v13, %v489_v7 }
 0x324   :  { %373 = vst [vmem:[%s625_s9] sm:$0xff] %v372_v14 }
 0x399   :  { %v391_v16 = vpop.xlane.xlu0 %390 }
 0x39a   :  { %v392_v18 = vcvt.f32.s32 %v391_v16 }
 0x39c   :  { %v395_v19 = vadd.s32 %v394_v17, %v392_v18 }
 0x39e   :  { %vm396_vm5 = vcmp.eq.s32.totalorder %v377_v63, %v395_v19 }
 0x39f   :  { %v434_v21 = vsel %vm396_vm5, 1.0, %v520_v20 }
 0x3a0   :  { %399 = vst [vmem:[%s624_s8] sm:$0xff] %v434_v21 }
 0x3a1   :  { %408 = vsyncpa [#allocation3], 1 }

</bundles_post_ra>
